<compile_context>
chip_gen: v6e
topology: v6e:2x2x1
jax: 0.10.0
libtpu: 0.0.40
codegen_flags: <defaults>
</compile_context>

<pallas_src>
import functools

import jax
import jax.numpy as jnp
from jax.experimental import pallas as pl
from jax.experimental.pallas import tpu as pltpu


def _elastic_cos_kernel(logits_ref, labels_ref, noise_ref, out_ref, *, s, tc):
    # logits_ref: (TM, TC), labels_ref: (TM, 1) i32, noise_ref: (TM, 1) f32
    j = pl.program_id(1)                                    # column-block index
    x = logits_ref[...]                                     # native dtype (f32/bf16)
    lab_local = labels_ref[...] - j * tc                    # (TM, 1): block-local target col
    noise = noise_ref[...].astype(x.dtype)                  # (TM, 1)

    # hit iff block-local column == label - block offset.  labels == -1 (and any
    # negative label) can never match since the iota is >= 0, so no extra mask
    # is needed.  NOTE: negative labels other than -1 are treated as "no hit"
    # (PyTorch negative indexing would wrap to column C+label).
    col = jax.lax.broadcasted_iota(jnp.int32, x.shape, 1)   # (TM, TC)
    hit = col == lab_local                                  # broadcast (TM,1) -> (TM,TC)

    out_ref[...] = (jnp.where(hit, x - noise, x) * s).astype(out_ref.dtype)


def _round_down(x, m):
    return (x // m) * m


def _choose_tiles(N, C, dtype):
    """Generation-aware tile selection for a streaming kernel."""
    itemsize = jnp.dtype(dtype).itemsize
    sub = {4: 8, 2: 16, 1: 32}.get(itemsize, 8)             # min sublane multiple per dtype

    try:
        vmem_cap = pltpu.get_tpu_info().vmem_capacity_bytes
    except Exception:  # pragma: no cover - conservative fallback
        vmem_cap = 64 * 1024 * 1024
    if vmem_cap >= 96 * 1024 * 1024:        # v5e / v6e: 128 MiB VMEM
        max_tile_bytes = 8 * 1024 * 1024    # 2x in + 2x out double-buffered ~= 32 MiB
        vmem_limit = 64 * 1024 * 1024
    else:                                   # v7x: 64 MiB VMEM per TensorCore
        max_tile_bytes = 4 * 1024 * 1024    # keeps total <= ~20 MiB of the 32 MiB scope
        vmem_limit = 32 * 1024 * 1024

    # Column tile: lane-dense multiple of 128 (capped at 2048); for small C use
    # the full dim (exempt from the 128 rule).  Never exceeds C.
    tc = C if C < 128 else min(2048, _round_down(C, 128))

    # Row tile: multiple of `sub` (or the full dim for tiny N), sized to budget.
    if N < sub:
        tm = N
    else:
        tm = max(sub, min(2048, _round_down(max_tile_bytes // (tc * itemsize), sub)))
        tm = min(tm, _round_down(N, sub))
    return tm, tc, vmem_limit


def elastic_cos_forward(logits, labels, noise, s, *, row_tile=None, col_tile=None):
    """logits: [N, C], labels: [N] int, noise: [N] f32 (= mean + sigma * z)."""
    N, C = logits.shape
    tm, tc, vmem_limit = _choose_tiles(N, C, logits.dtype)
    if col_tile is not None:
        tc = col_tile
    if row_tile is not None:
        tm = row_tile

    labels2d = labels.astype(jnp.int32).reshape(N, 1)
    noise2d = noise.astype(jnp.float32).reshape(N, 1)

    itemsize = jnp.dtype(logits.dtype).itemsize
    cost = pl.CostEstimate(
        flops=3 * N * C,
        bytes_accessed=2 * N * C * itemsize + 8 * N,
        transcendentals=0,
    )

    kernel = functools.partial(_elastic_cos_kernel, s=float(s), tc=tc)
    out = pl.pallas_call(
        kernel,
        out_shape=jax.ShapeDtypeStruct((N, C), logits.dtype),
        grid_spec=pltpu.PrefetchScalarGridSpec(
            num_scalar_prefetch=0,
            grid=(pl.cdiv(N, tm), pl.cdiv(C, tc)),           # non-divisible grid OK
            in_specs=[
                pl.BlockSpec((tm, tc), lambda i, j: (i, j)),
                # constant block index along the column axis -> fetched once per
                # row block, not once per grid step
                pl.BlockSpec((tm, 1), lambda i, j: (i, 0)),
                pl.BlockSpec((tm, 1), lambda i, j: (i, 0)),
            ],
            out_specs=pl.BlockSpec((tm, tc), lambda i, j: (i, j)),
        ),
        compiler_params=pltpu.CompilerParams(
            dimension_semantics=("parallel", "parallel"),    # both axes independent
            vmem_limit_bytes=vmem_limit,
        ),
        cost_estimate=cost,
        input_output_aliases={0: 0},   # in-place update, like the PyTorch module
    )(logits, labels2d, noise2d)
    return out


def _reference(logits, labels, noise, s):
    N, C = logits.shape
    hit = (jax.lax.broadcasted_iota(jnp.int32, (N, C), 1) == labels[:, None]) & (
        labels[:, None] != -1
    )
    noise_c = noise[:, None].astype(logits.dtype)
    return jnp.where(hit, logits - noise_c, logits) * s


if __name__ == "__main__":
    # Module parameters = [s, mean, sigma]
    s, mean, sigma = 64.0, 0.25, 0.0125

    key = jax.random.PRNGKey(0)

    # TODO(synk): torch.normal is drawn inside forward(); here the per-row elastic
    # noise is generated with jax.random outside the kernel and passed in.
    def make_case(key, N, C, dtype=jnp.float32):
        k_logits, k_labels, k_mask, k_noise = jax.random.split(key, 4)
        logits = jax.random.normal(k_logits, (N, C), dtype=jnp.float32).astype(dtype)
        labels = jax.random.randint(k_labels, (N,), 0, C, dtype=jnp.int32)
        drop = jax.random.bernoulli(k_mask, 0.25, (N,))
        labels = jnp.where(drop, jnp.int32(-1), labels)
        noise = mean + sigma * jax.random.normal(k_noise, (N,), dtype=jnp.float32)
        return logits, labels, noise

    k1, k2, k3 = jax.random.split(key, 3)

    # Case 1: aligned shapes (single tile, in-place alias fast path).
    logits, labels, noise = make_case(k1, 16, 128)
    out = jax.block_until_ready(elastic_cos_forward(logits, labels, noise, s))
    assert jnp.allclose(out, _reference(logits, labels, noise, s), atol=1e-5, rtol=1e-5)

    # Case 2: ragged shapes (non-divisible grid: padded edge blocks in both axes).
    logits, labels, noise = make_case(k2, 13, 200)
    out = jax.block_until_ready(elastic_cos_forward(logits, labels, noise, s))
    assert out.shape == (13, 200)
    assert jnp.allclose(out, _reference(logits, labels, noise, s), atol=1e-5, rtol=1e-5)

    # Case 3: bf16 streaming path (halved HBM traffic, native-dtype compute).
    logits, labels, noise = make_case(k3, 32, 256, dtype=jnp.bfloat16)
    out = jax.block_until_ready(elastic_cos_forward(logits, labels, noise, s))
    ref = _reference(logits, labels, noise, s)
    assert jnp.allclose(out.astype(jnp.float32), ref.astype(jnp.float32), atol=1e-2, rtol=1e-2)

    print("KERNEL_OK")
</pallas_src>

<mosaic_0001>
module attributes {stable_mosaic.version = 11 : i64} {
  func.func @_elastic_cos_kernel(%arg0: i32, %arg1: i32, %arg2: memref<16x128xf32, #tpu.memory_space<vmem>>, %arg3: memref<16x1xi32, #tpu.memory_space<vmem>>, %arg4: memref<16x1xf32, #tpu.memory_space<vmem>>, %arg5: memref<16x128xf32, #tpu.memory_space<vmem>>) attributes {dimension_semantics = [#tpu.dimension_semantics<parallel>, #tpu.dimension_semantics<parallel>], iteration_bounds = array<i64: 1, 1>, scalar_prefetch = 0 : i64, scratch_operands = 0 : i64, tpu.core_type = #tpu.core_type<tc>, window_params = [{transform_indices = @transform_0, window_bounds = array<i64: 16, 128>}, {transform_indices = @transform_1, window_bounds = array<i64: 16, 1>}, {transform_indices = @transform_2, window_bounds = array<i64: 16, 1>}, {transform_indices = @transform_3, window_bounds = array<i64: 16, 128>}]} {
    %c0 = arith.constant 0 : index
    %c0_0 = arith.constant 0 : index
    %0 = vector.load %arg2[%c0, %c0_0] : memref<16x128xf32, #tpu.memory_space<vmem>>, vector<16x128xf32>
    %c0_1 = arith.constant 0 : index
    %c0_2 = arith.constant 0 : index
    %1 = vector.load %arg3[%c0_1, %c0_2] : memref<16x1xi32, #tpu.memory_space<vmem>>, vector<16x1xi32>
    %c128_i32 = arith.constant 128 : i32
    %2 = arith.muli %arg1, %c128_i32 : i32
    %3 = vector.broadcast %2 : i32 to vector<16x1xi32>
    %4 = arith.subi %1, %3 : vector<16x1xi32>
    %c0_3 = arith.constant 0 : index
    %c0_4 = arith.constant 0 : index
    %5 = vector.load %arg4[%c0_3, %c0_4] : memref<16x1xf32, #tpu.memory_space<vmem>>, vector<16x1xf32>
    %6 = tpu.iota {dimensions = array<i32: 1>} : vector<16x128xi32>
    %7 = vector.broadcast %4 : vector<16x1xi32> to vector<16x128xi32>
    %8 = arith.cmpi eq, %6, %7 : vector<16x128xi32>
    %9 = vector.broadcast %5 : vector<16x1xf32> to vector<16x128xf32>
    %10 = arith.subf %0, %9 : vector<16x128xf32>
    %11 = arith.select %8, %10, %0 : vector<16x128xi1>, vector<16x128xf32>
    %cst = arith.constant 6.400000e+01 : f32
    %12 = vector.broadcast %cst : f32 to vector<16x128xf32>
    %13 = arith.mulf %11, %12 : vector<16x128xf32>
    %c0_5 = arith.constant 0 : index
    %c0_6 = arith.constant 0 : index
    %14 = vector.load %arg5[%c0_5, %c0_6] : memref<16x128xf32, #tpu.memory_space<vmem>>, vector<16x128xf32>
    tpu.vector_store %arg5[%c0_5, %c0_6], %13 {strides = array<i32>} : memref<16x128xf32, #tpu.memory_space<vmem>>, vector<16x128xf32>,
    return
  }
  func.func @transform_0(%arg0: i32, %arg1: i32) -> (i32, i32) {
    %c0_i32 = arith.constant 0 : i32
    return %arg0, %arg1 : i32, i32
  }
  func.func @transform_1(%arg0: i32, %arg1: i32) -> (i32, i32) {
    %c0_i32 = arith.constant 0 : i32
    %c0_i32_0 = arith.constant 0 : i32
    return %arg0, %c0_i32 : i32, i32
  }
  func.func @transform_2(%arg0: i32, %arg1: i32) -> (i32, i32) {
    %c0_i32 = arith.constant 0 : i32
    %c0_i32_0 = arith.constant 0 : i32
    return %arg0, %c0_i32 : i32, i32
  }
  func.func @transform_3(%arg0: i32, %arg1: i32) -> (i32, i32) {
    %c0_i32 = arith.constant 0 : i32
    return %arg0, %arg1 : i32, i32
  }
}

</mosaic_0001>

<bundles_post_ra>
// kernel: tpu_custom_call.1
= control target key start
LH: loop header
LB: loop body
LE: loop exit
PB: predicated region body
PF: predicated region fallthrough
CT: control target
= control target key end

     0   :  { %8 = vsyncpa [#allocation3], 0  ;;  %s184_s0 = inlined_call_operand.hbm [shape: f32[16,128], index: 0, kind: input, shape index: {}, may-alias: {0,3}]   ;;  %s185_s1 = inlined_call_operand.vmem [shape: s32[16,1], index: 1, kind: input, shape index: {}]   ;;  %s186_s2 = inlined_call_operand.vmem [shape: f32[16,1], index: 2, kind: input, shape index: {}]   ;;  %s187_s3 = inlined_call_operand.hbm [shape: f32[16,128], index: 3, kind: output, shape index: {}, may-alias: {0,3}]  }
   0x1   :  { %9 = vsyncpa [#allocation4], 0  ;;  %s135_s12 = smov [#allocation2]  }
   0x2   :  { %s15_s13 = sshll.u32 %s135_s12, 4  ;;  %s16_s13 = int_to_ptr.vmem [resolvable:$true] %s15_s13 }
   0x3   :  { %s99_s14 = scalar_lea.vmem %s16_s13, 256  ;;  %p104_p1 = scmp.lt.s32.totalorder %s16_s13, %s16_s13 }
   0x4   :  { %p100_p0 = scmp.ne.s32.totalorder %s16_s13, %s99_s14  ;;  %p105_p2 = scmp.lt.s32.totalorder %s99_s14, %s99_s14 }
   0x6   :  { %p106_p3 = por %p105_p2, %p104_p1 }
   0x8   :  { %p107_p4 = pnand %p106_p3, %p100_p0 }
   0xa   :  { %110 = shalt.err (!%p107_p4)
}
   0xb   :  { %s136_s15 = smov 128   ;;  %s137_s16 = smov 8  }
   0xc   :  { %21 = dma.hbm_to_vmem [thread:$0]  %s184_s0, 256, %s16_s13, [#allocation3], %s136_s15, %s136_s15, %s137_s16  }
   0xd   :  { %131 = dma.done.wait [#allocation3], 256  }
   0xe   :  { %132 = vsyncadd [#allocation3], 4294967040  ;;  %v138_v0 = vmov 0   ;;  %v37_v1 = vld [vmem:[%s186_s2] sm:$0xff]  ;;  %v38_v3 = vld [vmem:[%s186_s2 + $0x8] sm:$0xff]  ;;  %v39_v5 = vlaneseq  ;;  %s139_s2 = smov [#allocation5]  }
   0xf   :  { %90 = vset.pattern.permute.xlu1 %v138_v0  ;;  %89 = vset.pattern.permute.xlu0 %v138_v0  ;;  %v31_v2 = vld [vmem:[%s185_s1] sm:$0xff]  ;;  %v32_v4 = vld [vmem:[%s185_s1 + $0x8] sm:$0xff]  ;;  %s72_s26 = sshll.u32 %s139_s2, 4  ;;  %s73_s26 = int_to_ptr.vmem [resolvable:$true] %s72_s26 }
  0x10   :  { %51 = vperm.xlu0 %89, %v37_v1   ;;  %42 = vperm.xlu1 %90, %v31_v2   ;;  %v40_v6 = vand.u32 127, %v39_v5  ;;  %v29_v7 = vld [vmem:[#allocation2] sm:$0xff]  ;;  %v30_v11 = vld [vmem:[#allocation2 + $0x8] sm:$0xff]  ;;  %s111_s1 = scalar_lea.vmem %s73_s26, 256  ;;  %p116_p6 = scmp.lt.s32.totalorder %s73_s26, %s73_s26 }
  0x11   :  { %p112_p5 = scmp.ne.s32.totalorder %s73_s26, %s111_s1  ;;  %p117_p7 = scmp.lt.s32.totalorder %s111_s1, %s111_s1 }
  0x13   :  { %p118_p8 = por %p117_p7, %p116_p6 }
  0x14   :  { %56 = vperm.xlu0 %89, %v38_v3   ;;  %45 = vperm.xlu1 %90, %v32_v4  }
  0x15   :  { %p119_p9 = pnand %p118_p8, %p112_p5 }
  0x8b   :  { %v52_v8 = vpop.permute.xlu0 %51  ;;  %v43_v9 = vpop.permute.xlu1 %42 }
  0x8c   :  { %v59_v10 = vsub.f32 %v29_v7, %v52_v8  ;;  %vm47_vm0 = vcmp.eq.s32.totalorder %v40_v6, %v43_v9 }
  0x8e   :  { %v61_v12 = vsel %vm47_vm0, %v59_v10, %v29_v7 }
  0x8f   :  { %v63_v13 = vmul.f32 64.0, %v61_v12  ;;  %v57_v14 = vpop.permute.xlu0 %56  ;;  %v46_v15 = vpop.permute.xlu1 %45 }
  0x90   :  { %v60_v16 = vsub.f32 %v30_v11, %v57_v14  ;;  %vm48_vm1 = vcmp.eq.s32.totalorder %v40_v6, %v46_v15 }
  0x91   :  { %65 = vst [vmem:[#allocation5] sm:$0xff] %v63_v13 }
  0x92   :  { %v62_v17 = vsel %vm48_vm1, %v60_v16, %v30_v11 }
  0x93   :  { %v64_v18 = vmul.f32 64.0, %v62_v17 }
  0x95   :  { %66 = vst [vmem:[#allocation5 + $0x8] sm:$0xff] %v64_v18 }
  0x96   :  { %122 = shalt.err (!%p119_p9)
}
  0x97   :  { %78 = dma.vmem_to_hbm [thread:$0]  %s73_s26, 256, %s187_s3, [#allocation4], %s136_s15, %s136_s15, %s137_s16  }
  0x98   :  { %133 = dma.done.wait [#allocation4], 256  }
  0x99   :  { %134 = vsyncadd [#allocation4], 4294967040 }
  0x9a   :  { %82 = vsyncpa [#allocation3], 1 }
  0x9b   :  { %83 = vsyncpa [#allocation4], 1 }

</bundles_post_ra>
